<compile_context>
chip_gen: v5e
topology: v5e:2x2
jax: 0.10.0
libtpu: 0.0.40
codegen_flags: <defaults>
</compile_context>

<pallas_src>
from functools import partial

import jax
import jax.numpy as jnp
from jax.experimental import pallas as pl
from jax.experimental.pallas import tpu as pltpu


def _shift_lanes(x, s, width):
    """Return t with t[:, c] = x[:, c + s]; cross-row/end bleed is masked by caller.

    Uses an XLU lane rotate (pltpu.roll) when the lane extent is 128-aligned (the
    production case); falls back to a slice+concat shift for small/unaligned widths.
    """
    if width % 128 == 0:
        return pltpu.roll(x, (-s) % width, 1)        # rolled[:, c] = x[:, (c + s) % width]
    rows = x.shape[0]
    if s < 0:
        z = jnp.zeros((rows, -s), x.dtype)
        return jnp.concatenate([z, x[:, : width + s]], axis=1)
    z = jnp.zeros((rows, s), x.dtype)
    return jnp.concatenate([x[:, s:], z], axis=1)


def _sac1d_kernel(x_ref, pos_ref, w_ref, b_ref, o_ref, *, ksize, pad, seg_len):
    """One grid step: conv over a whole batch tile as a single lane-dense matmul.

    x_ref: (Cin_pad, b_tile*L)   batch-tile slab; lane c = (row c//L, position c%L)
    pos_ref: (1, b_tile*L)       c % L, precomputed in the wrapper (row-boundary mask)
    w_ref: (Cout, K*Cin_pad)     merged effective weight, k-major / ci-minor rows
    b_ref: (Cout, 1)             bias
    o_ref: (Cout, b_tile*L)      lane-dense output block
    """
    _, width = x_ref.shape
    x = x_ref[...]
    pos = pos_ref[...]                               # position of each lane within its row
    taps = []
    for k in range(ksize):                           # static loop; tap k reads x[:, c + s]
        s = k - pad
        if s == 0:
            taps.append(x)
            continue
        t = _shift_lanes(x, s, width)
        # Zero the <= pad columns per row where the shift bleeds across a row
        # boundary (this also covers the wrap-around at the two slab ends).
        valid = (pos >= -s) if s < 0 else (pos < seg_len - s)
        taps.append(jnp.where(valid, t, jnp.zeros_like(t)))
    x_unf = jnp.concatenate(taps, axis=0)            # (K*Cin_pad, width); 8-aligned pieces
    # Single MXU call for the whole tile, f32 accumulation, one bias add.
    y = jnp.dot(w_ref[...], x_unf, preferred_element_type=jnp.float32)
    o_ref[...] = (y + b_ref[...]).astype(o_ref.dtype)


def _tpu_generation():
    """(tensorcores sharing the grid, vmem_limit_bytes) by chip generation."""
    try:
        kind = jax.devices()[0].device_kind.lower()
    except Exception:
        kind = ""
    if "7" in kind:                                   # v7x: 2 TCs/chip, 64 MiB physical VMEM
        return 2, 48 * 1024 * 1024
    return 1, 100 * 1024 * 1024                       # v5e / v6e: 1 TC, 128 MiB physical VMEM


def _pick_batch_tile(n, seg_len, cin_pad, cout, x_itemsize, out_itemsize,
                     num_cores, block_budget_bytes):
    """Largest batch tile whose double-buffered x+out blocks fit the VMEM budget.

    Block lane extents must be a multiple of 128 unless the block spans the whole
    array, so b_tile is admissible iff b_tile == n or (b_tile*L) % 128 == 0.  On
    multi-TensorCore chips (v7x) prefer step counts that are a multiple of the core
    count so no core idles; otherwise prefer the fewest, largest steps.
    """
    def admissible(bt):
        return bt == n or (bt * seg_len) % 128 == 0

    def step_bytes(bt):   # double-buffered input slab + output block per grid step
        return 2 * bt * seg_len * (cin_pad * x_itemsize + cout * out_itemsize)

    divisors = [d for d in range(1, n + 1) if n % d == 0 and admissible(d)]
    if not divisors:
        divisors = [n]
    fitting = [d for d in divisors if step_bytes(d) <= block_budget_bytes]
    if not fitting:
        fitting = [min(divisors)]
    balanced = [d for d in fitting if (n // d) % num_cores == 0]
    return max(balanced or fitting)


def scale_aware_conv1d(x, dx, W, b, ps, *, b_tile=None):
    """x: (N, Cin, L), dx: scalar, W: (P, Cout, Cin, K), b: (Cout,) or None.

    Returns (N, Cout, L), matching the PyTorch module's forward (padding=1).
    """
    P, Cout, Cin, K = W.shape
    N, Cin_x, L = x.shape
    assert Cin_x == Cin and P == len(ps)
    pad = 1  # the module hardcodes padding=1
    # With padding=1 the PyTorch output length equals L only for K == 3.
    assert K == 2 * pad + 1, (
        f"kernel assumes 'same' conv (K == {2 * pad + 1}) because the module "
        f"hardcodes padding={pad}; got K={K}")

    out_dtype = x.dtype
    dx = jnp.asarray(dx, jnp.float32)
    # Merge the P scale branches (conv is linear in W):
    #   sum_i conv(x, dx**ps[i]*W[i]) == conv(x, sum_i dx**ps[i]*W[i]).
    scales = jnp.stack([dx ** p for p in ps]).astype(jnp.float32)            # (P,)
    w_eff = jnp.tensordot(scales, W.astype(jnp.float32), axes=([0], [0]))    # (Cout, Cin, K)

    # Pad Cin to a multiple of 8 so the in-kernel sublane concat is tile-aligned.
    cin_pad = ((Cin + 7) // 8) * 8
    # Flatten to (Cout, K*cin_pad), k-major / ci-minor, matching the kernel's im2col.
    w2d = jnp.transpose(w_eff, (0, 2, 1))                                    # (Cout, K, Cin)
    w2d = jnp.pad(w2d, ((0, 0), (0, 0), (0, cin_pad - Cin)))
    w2d = w2d.reshape(Cout, K * cin_pad).astype(x.dtype)

    if b is None:
        b = jnp.zeros((Cout,), jnp.float32)
    b2 = b.reshape(Cout, 1).astype(jnp.float32)

    # Layout plumbing (wrapper side): present x as a lane-dense (cin_pad, N*L) slab
    # so each grid step does ONE matmul with a b_tile*L-wide lane axis and the
    # kernel's stores are unmasked even when L < 128.
    x_slab = jnp.transpose(x, (1, 0, 2)).reshape(Cin, N * L)
    if cin_pad != Cin:
        x_slab = jnp.pad(x_slab, ((0, cin_pad - Cin), (0, 0)))
    # Per-lane position within its batch row, for the cross-row-boundary tap mask.
    pos = (jnp.arange(N * L, dtype=jnp.int32) % L).reshape(1, N * L)

    num_cores, vmem_limit = _tpu_generation()
    # Leave headroom for the replicated (double-buffered) weight/bias blocks and
    # compiler scratch when sizing the x/out blocks.
    w_bytes = int(w2d.size) * w2d.dtype.itemsize + int(b2.size) * 4
    block_budget = max(int(0.6 * vmem_limit) - 2 * w_bytes, 1)
    if b_tile is None:
        b_tile = _pick_batch_tile(N, L, cin_pad, Cout, x_slab.dtype.itemsize,
                                  jnp.dtype(out_dtype).itemsize, num_cores,
                                  block_budget)
    assert N % b_tile == 0
    width = b_tile * L
    grid = (N // b_tile,)

    kernel = partial(_sac1d_kernel, ksize=K, pad=pad, seg_len=L)

    # TODO(synk): for production channel counts add a Cout grid axis with a tiled
    # weight BlockSpec (single-buffered, since its index_map is constant) so weights
    # and the (Cout, b_tile*L) block stay inside v7x's 64 MiB VMEM.
    out_flat = pl.pallas_call(
        kernel,
        out_shape=jax.ShapeDtypeStruct((Cout, N * L), out_dtype),
        grid=grid,
        in_specs=[
            pl.BlockSpec((cin_pad, width), lambda n: (0, n)),      # batch-tile slab
            pl.BlockSpec((1, width), lambda n: (0, n)),            # per-lane row position
            pl.BlockSpec((Cout, K * cin_pad), lambda n: (0, 0)),   # merged weights (replicated)
            pl.BlockSpec((Cout, 1), lambda n: (0, 0)),             # bias
        ],
        out_specs=pl.BlockSpec((Cout, width), lambda n: (0, n)),   # lane-dense output
        compiler_params=pltpu.CompilerParams(
            dimension_semantics=("parallel",),
            vmem_limit_bytes=vmem_limit,
        ),
    )(x_slab, pos, w2d, b2)

    # Back to the PyTorch (N, Cout, L) layout.
    return jnp.transpose(out_flat.reshape(Cout, N, L), (1, 0, 2))


def _ref_forward(x, dx, W, b, ps):
    # Pure-JAX reference matching the PyTorch forward exactly (per-branch convs).
    outs = []
    for i, p in enumerate(ps):
        w_i = (dx ** p) * W[i]                                 # (Cout, Cin, K)
        o = jax.lax.conv_general_dilated(
            x, w_i, window_strides=(1,), padding=[(1, 1)],
            dimension_numbers=("NCH", "OIH", "NCH"),
            precision=jax.lax.Precision.HIGHEST,
        )
        outs.append(o)
    xn = jnp.sum(jnp.stack(outs), axis=0)
    if b is not None:
        xn = xn + b[None, :, None]
    return xn


if __name__ == "__main__":
    key = jax.random.PRNGKey(0)
    k1, k2, k3 = jax.random.split(key, 3)

    # Small shapes consistent with the module's conv1d forward.
    N, Cin, Cout, L, K = 2, 4, 4, 16, 3
    ps = [0, -1]

    x = jax.random.normal(k1, (N, Cin, L), dtype=jnp.float32)
    W = 0.0001 * jax.random.normal(k2, (len(ps), Cout, Cin, K), dtype=jnp.float32)
    b = 0.0001 * jax.random.normal(k3, (Cout,), dtype=jnp.float32)
    dx = jnp.float32(0.5)

    out = scale_aware_conv1d(x, dx, W, b, ps)
    out = jax.block_until_ready(out)

    ref = _ref_forward(x, dx, W, b, ps)
    assert out.shape == (N, Cout, L)
    # Tolerance accommodates the kernel's default-precision MXU matmul (bf16 operand
    # truncation) vs the HIGHEST-precision conv reference; structural bugs would be
    # orders of magnitude larger.
    max_err = float(jnp.max(jnp.abs(out - ref)))
    assert jnp.allclose(out, ref, atol=2e-5, rtol=2e-2), max_err

    print("KERNEL_OK")
</pallas_src>

<mosaic_0001>
module attributes {stable_mosaic.version = 11 : i64} {
  func.func @_sac1d_kernel(%arg0: i32, %arg1: memref<8x32xf32, #tpu.memory_space<vmem>>, %arg2: memref<1x32xi32, #tpu.memory_space<vmem>>, %arg3: memref<4x24xf32, #tpu.memory_space<vmem>>, %arg4: memref<4x1xf32, #tpu.memory_space<vmem>>, %arg5: memref<4x32xf32, #tpu.memory_space<vmem>>) attributes {dimension_semantics = [#tpu.dimension_semantics<parallel>], iteration_bounds = array<i64: 1>, scalar_prefetch = 0 : i64, scratch_operands = 0 : i64, tpu.core_type = #tpu.core_type<tc>, window_params = [{transform_indices = @transform_0, window_bounds = array<i64: 8, 32>}, {transform_indices = @transform_1, window_bounds = array<i64: 1, 32>}, {pipeline_mode = #tpu.pipeline_mode<synchronous>, transform_indices = @transform_2, window_bounds = array<i64: 4, 24>}, {pipeline_mode = #tpu.pipeline_mode<synchronous>, transform_indices = @transform_3, window_bounds = array<i64: 4, 1>}, {transform_indices = @transform_4, window_bounds = array<i64: 4, 32>}]} {
    %c0 = arith.constant 0 : index
    %c0_0 = arith.constant 0 : index
    %0 = vector.load %arg1[%c0, %c0_0] : memref<8x32xf32, #tpu.memory_space<vmem>>, vector<8x32xf32>
    %c0_1 = arith.constant 0 : index
    %c0_2 = arith.constant 0 : index
    %1 = vector.load %arg2[%c0_1, %c0_2] : memref<1x32xi32, #tpu.memory_space<vmem>>, vector<1x32xi32>
    %cst = arith.constant 0.000000e+00 : f32
    %2 = vector.broadcast %cst : f32 to vector<8x1xf32>
    %3 = vector.extract_strided_slice %0 {offsets = [0, 0], sizes = [8, 31], strides = [1, 1]} : vector<8x32xf32> to vector<8x31xf32>
    %4 = tpu.concatenate %2, %3 in 1 : vector<8x1xf32>, vector<8x31xf32> -> vector<8x32xf32>
    %c1_i32 = arith.constant 1 : i32
    %5 = vector.broadcast %c1_i32 : i32 to vector<1x32xi32>
    %6 = arith.cmpi sge, %1, %5 : vector<1x32xi32>
    %cst_3 = arith.constant 0.000000e+00 : f32
    %7 = vector.broadcast %cst_3 : f32 to vector<8x32xf32>
    %8 = vector.shape_cast %6 : vector<1x32xi1> to vector<1x32xi1>
    %9 = vector.broadcast %8 : vector<1x32xi1> to vector<8x32xi1>
    %10 = arith.select %9, %4, %7 : vector<8x32xi1>, vector<8x32xf32>
    %cst_4 = arith.constant 0.000000e+00 : f32
    %11 = vector.broadcast %cst_4 : f32 to vector<8x1xf32>
    %12 = vector.extract_strided_slice %0 {offsets = [0, 1], sizes = [8, 31], strides = [1, 1]} : vector<8x32xf32> to vector<8x31xf32>
    %13 = tpu.concatenate %12, %11 in 1 : vector<8x31xf32>, vector<8x1xf32> -> vector<8x32xf32>
    %c15_i32 = arith.constant 15 : i32
    %14 = vector.broadcast %c15_i32 : i32 to vector<1x32xi32>
    %15 = arith.cmpi slt, %1, %14 : vector<1x32xi32>
    %cst_5 = arith.constant 0.000000e+00 : f32
    %16 = vector.broadcast %cst_5 : f32 to vector<8x32xf32>
    %17 = vector.shape_cast %15 : vector<1x32xi1> to vector<1x32xi1>
    %18 = vector.broadcast %17 : vector<1x32xi1> to vector<8x32xi1>
    %19 = arith.select %18, %13, %16 : vector<8x32xi1>, vector<8x32xf32>
    %20 = tpu.concatenate %10, %0, %19 in 0 : vector<8x32xf32>, vector<8x32xf32>, vector<8x32xf32> -> vector<24x32xf32>
    %c0_6 = arith.constant 0 : index
    %c0_7 = arith.constant 0 : index
    %21 = vector.load %arg3[%c0_6, %c0_7] : memref<4x24xf32, #tpu.memory_space<vmem>>, vector<4x24xf32>
    %cst_8 = arith.constant dense<0.000000e+00> : vector<4x32xf32>
    %22 = tpu.matmul %21, %20, %cst_8 {dimension_numbers = #tpu.dot_dimension_numbers<[1], [0], [0], [1], [0, 0, 1, 1], [], []>} : vector<4x24xf32>, vector<24x32xf32>, vector<4x32xf32> -> vector<4x32xf32>
    %c0_9 = arith.constant 0 : index
    %c0_10 = arith.constant 0 : index
    %23 = vector.load %arg4[%c0_9, %c0_10] : memref<4x1xf32, #tpu.memory_space<vmem>>, vector<4x1xf32>
    %24 = vector.broadcast %23 : vector<4x1xf32> to vector<4x32xf32>
    %25 = arith.addf %22, %24 : vector<4x32xf32>
    %c0_11 = arith.constant 0 : index
    %c0_12 = arith.constant 0 : index
    %26 = vector.load %arg5[%c0_11, %c0_12] : memref<4x32xf32, #tpu.memory_space<vmem>>, vector<4x32xf32>
    tpu.vector_store %arg5[%c0_11, %c0_12], %25 {strides = array<i32>} : memref<4x32xf32, #tpu.memory_space<vmem>>, vector<4x32xf32>,
    return
  }
  func.func @transform_0(%arg0: i32) -> (i32, i32) {
    %c0_i32 = arith.constant 0 : i32
    %c0_i32_0 = arith.constant 0 : i32
    return %c0_i32, %arg0 : i32, i32
  }
  func.func @transform_1(%arg0: i32) -> (i32, i32) {
    %c0_i32 = arith.constant 0 : i32
    %c0_i32_0 = arith.constant 0 : i32
    return %c0_i32, %arg0 : i32, i32
  }
  func.func @transform_2(%arg0: i32) -> (i32, i32) {
    %c0_i32 = arith.constant 0 : i32
    %c0_i32_0 = arith.constant 0 : i32
    %c0_i32_1 = arith.constant 0 : i32
    return %c0_i32, %c0_i32_0 : i32, i32
  }
  func.func @transform_3(%arg0: i32) -> (i32, i32) {
    %c0_i32 = arith.constant 0 : i32
    %c0_i32_0 = arith.constant 0 : i32
    %c0_i32_1 = arith.constant 0 : i32
    return %c0_i32, %c0_i32_0 : i32, i32
  }
  func.func @transform_4(%arg0: i32) -> (i32, i32) {
    %c0_i32 = arith.constant 0 : i32
    %c0_i32_0 = arith.constant 0 : i32
    return %c0_i32, %arg0 : i32, i32
  }
}

</mosaic_0001>

<bundles_post_ra>
// kernel: tpu_custom_call.1
= control target key start
LH: loop header
LB: loop body
LE: loop exit
PB: predicated region body
PF: predicated region fallthrough
CT: control target
= control target key end

     0   :  { %9 = vsyncpa [#allocation3], 0  ;;  %s212_s0 = inlined_call_operand.hbm [shape: f32[8,32], index: 0, kind: input, shape index: {}]   ;;  %s213_s1 = inlined_call_operand.vmem [shape: s32[1,32], index: 1, kind: input, shape index: {}]   ;;  %s214_s2 = inlined_call_operand.vmem [shape: f32[4,24], index: 2, kind: input, shape index: {}]   ;;  %s215_s3 = inlined_call_operand.vmem [shape: f32[4,1], index: 3, kind: input, shape index: {}]   ;;  %s216_s4 = inlined_call_operand.hbm [shape: f32[4,32], index: 4, kind: output, shape index: {}]  }
   0x1   :  { %10 = vsyncpa [#allocation4], 0  ;;  %s16_s17 = sshll.u32 %s212_s0, 4  ;;  %s167_s18 = smov [#allocation2]   ;;  %s17_s17 = int_to_ptr.hbm [resolvable:$true] %s16_s17 }
   0x2   :  { %s18_s19 = sshll.u32 %s167_s18, 4  ;;  %s19_s19 = int_to_ptr.vmem [resolvable:$true] %s18_s19 }
   0x3   :  { %21 = dma.hbm_to_vmem [thread:$0]  %s17_s17, 128, %s19_s19, [#allocation3]  }
   0x4   :  { %163 = dma.done.wait [#allocation3], 128  }
   0x5   :  { %164 = vsyncadd [#allocation3], 4294967168  ;;  %v32_v0 = vld [vmem:[#allocation2] sm:$0xff]  ;;  %s168_s20 = smov 127   ;;  %s169_s21 = smov 1   ;;  %v170_v1 = vmov 0  }
   0x6   :  { %45 = vrot.lane.b32.xlu0 %v32_v0, %s168_s20  ;;  %113 = vset.pattern.permute.xlu1 %v170_v1  ;;  %v56_v2 = vld [vmem:[%s215_s3] sm:$0xf]  ;;  %vm48_vm2 = vcmask 252928   ;;  %vm38_vm4 = vcmask 7168   ;;  %vm62_vm6 = vcmask 195584   ;;  %s95_s29 = sshll.u32 %s216_s4, 4  ;;  %s96_s29 = int_to_ptr.hbm [resolvable:$true] %s95_s29 }
   0x7   :  { %114 = vset.pattern.permute.xlu0 %v170_v1  ;;  %59 = vperm.xlu1 %113, %v56_v2   ;;  %v33_v3 = vld [vmem:[%s213_s1] sm:$0x1]  ;;  %s171_s1 = smov [#allocation5]   ;;  %vm86_vm7 = vcmask 257024  }
   0x8   :  { %vm50_vm0 = vcmp.lt.s32.totalorder %v33_v3, 15  ;;  %vm40_vm1 = vcmp.ge.s32.totalorder %v33_v3, 1  ;;  %v55_v11 = vld [vmem:[%s214_s2] sm:$0xf]  ;;  %s93_s26 = sshll.u32 %s171_s1, 4  ;;  %s94_s26 = int_to_ptr.vmem [resolvable:$true] %s93_s26 }
   0x9   :  { %v51_v4 = vsel %vm50_vm0, 1, %v170_v1  ;;  %v41_v7 = vsel %vm40_vm1, 1, %v170_v1 }
   0xa   :  { %v52_v5 = vperm.slane %v51_v4, 0  ;;  %v42_v9 = vperm.slane %v41_v7, 0 }
   0xc   :  { %vm53_vm3 = vcmp.eq.s32.totalorder %v52_v5, 1  ;;  %vm43_vm5 = vcmp.eq.s32.totalorder %v42_v9, 1 }
   0xe   :  { %35 = vrot.lane.b32.xlu0 %v32_v0, %s169_s21 }
  0x78   :  { %v46_v6 = vpop.permute.xlu0 %45 }
  0x79   :  { %v49_v8 = vsel %vm48_vm2, %v46_v6, 0.0  ;;  %v60_v13 = vpop.permute.xlu1 %59 }
  0x7a   :  { %105 = vmatpush.msk.msra.mxu0 %vm53_vm3, %v49_v8 }
  0x7c   :  { %80 = vmatpush.msra.mxu0 %v32_v0 }
  0x80   :  { %v36_v10 = vpop.permute.xlu0 %35 }
  0x81   :  { %v39_v12 = vsel %vm38_vm4, 0.0, %v36_v10 }
  0x82   :  { %106 = vmatpush.msk.msra.mxu0 %vm43_vm5, %v39_v12 }
  0x83   :  { %107 = vmatmul.msk.f32.vlgmr.msra.gmra.mxu0 %vm62_vm6, %v55_v11 }
 0x100   :  { %v83_v14 = vpop.f32.mrf.mxu0 }
 0x101   :  { %v84_v15 = vadd.f32 %v83_v14, %v60_v13 }
 0x103   :  { %87 = vst.msk [vmem:[#allocation5] sm:$0xf] %vm86_vm7, %v84_v15 }
 0x104   :  { %98 = dma.vmem_to_hbm [thread:$0]  %s94_s26, 64, %s96_s29, [#allocation4]  }
 0x105   :  { %165 = dma.done.wait [#allocation4], 64  }
 0x106   :  { %166 = vsyncadd [#allocation4], 4294967232 }
 0x107   :  { %103 = vsyncpa [#allocation3], 1 }
 0x108   :  { %104 = vsyncpa [#allocation4], 1 }

</bundles_post_ra>
